<compile_context>
chip_gen: v5e
topology: v5e:2x2
jax: 0.10.0
libtpu: 0.0.40
codegen_flags: <defaults>
</compile_context>

<pallas_src>
import functools
import math

import jax
import jax.numpy as jnp
from jax.experimental import pallas as pl
from jax.experimental.pallas import tpu as pltpu


_VMEM_LIMIT = 32 * 1024 * 1024   # safe on v5e/v6e/v7x (v7x physical VMEM = 64 MiB)


def _round_up(x, m):
    return (x + m - 1) // m * m


def _pick_tm(m):
    mp = _round_up(m, 8)
    tm = min(mp, 512)
    return tm, _round_up(mp, tm)


def _pick_tn(n):
    npad = _round_up(n, 128)
    tn = min(npad, 256)
    return tn, _round_up(npad, tn)


def _pick_tk(k):
    kp = _round_up(k, 128)
    if kp <= 768:
        return kp, kp                      # single K step, no padding waste
    for tk in (512, 384, 256, 128):        # largest 128-multiple that divides K
        if kp % tk == 0:
            return tk, kp
    return 512, _round_up(kp, 512)


# -----------------------------------------------------------------------------
# Fused (matmul + folded-BN affine [+ residual] [+ ReLU]) Pallas kernel
# -----------------------------------------------------------------------------
def _mm_affine_kernel_factory(relu, has_res):
    def kernel(*refs):
        if has_res:
            a_ref, w_ref, s_ref, b_ref, r_ref, o_ref, acc_ref = refs
        else:
            a_ref, w_ref, s_ref, b_ref, o_ref, acc_ref = refs
        k = pl.program_id(2)

        @pl.when(k == 0)
        def _init():
            acc_ref[...] = jnp.zeros_like(acc_ref)

        acc_ref[...] += jnp.dot(a_ref[...], w_ref[...],
                                preferred_element_type=jnp.float32)

        @pl.when(k == pl.num_programs(2) - 1)
        def _epilogue():
            out = acc_ref[...] * s_ref[...] + b_ref[...]   # f32 BN affine
            if has_res:
                out = out + r_ref[...]
            if relu:
                out = jnp.maximum(out, 0.0)
            o_ref[...] = out.astype(o_ref.dtype)

    return kernel


def _matmul_bn_act(a, w, scale, shift, residual, relu):
    """out = [relu]( (A @ W) * scale + shift [+ residual] ), tiled on the MXU."""
    M, K = a.shape
    N = w.shape[1]
    tm, Mp = _pick_tm(M)
    tn, Np = _pick_tn(N)
    tk, Kp = _pick_tk(K)

    # bf16 MXU operands, f32 accumulation / epilogue.  Zero-padding K is exact.
    a_p = jnp.pad(a, ((0, Mp - M), (0, Kp - K))).astype(jnp.bfloat16)
    w_p = jnp.pad(w, ((0, Kp - K), (0, Np - N))).astype(jnp.bfloat16)
    s_p = jnp.pad(scale.astype(jnp.float32), ((0, 0), (0, Np - N)))
    b_p = jnp.pad(shift.astype(jnp.float32), ((0, 0), (0, Np - N)))

    ins = [a_p, w_p, s_p, b_p]
    in_specs = [
        pl.BlockSpec((tm, tk), lambda i, j, k: (i, k)),
        pl.BlockSpec((tk, tn), lambda i, j, k: (k, j)),
        pl.BlockSpec((1, tn), lambda i, j, k: (0, j)),
        pl.BlockSpec((1, tn), lambda i, j, k: (0, j)),
    ]
    has_res = residual is not None
    if has_res:
        ins.append(jnp.pad(residual.astype(jnp.float32),
                           ((0, Mp - M), (0, Np - N))))
        in_specs.append(pl.BlockSpec((tm, tn), lambda i, j, k: (i, j)))

    bytes_acc = (Mp * Kp + Kp * Np) * 2 + Mp * Np * 4 * (2 if has_res else 1)
    out = pl.pallas_call(
        _mm_affine_kernel_factory(relu=relu, has_res=has_res),
        out_shape=jax.ShapeDtypeStruct((Mp, Np), jnp.float32),
        grid=(Mp // tm, Np // tn, Kp // tk),
        in_specs=in_specs,
        out_specs=pl.BlockSpec((tm, tn), lambda i, j, k: (i, j)),
        scratch_shapes=[pltpu.VMEM((tm, tn), jnp.float32)],
        compiler_params=pltpu.CompilerParams(
            dimension_semantics=("parallel", "parallel", "arbitrary"),
            vmem_limit_bytes=_VMEM_LIMIT),
        cost_estimate=pl.CostEstimate(flops=2 * Mp * Kp * Np,
                                      transcendentals=0,
                                      bytes_accessed=bytes_acc),
    )(*ins)
    return out[:M, :N]


# -----------------------------------------------------------------------------
# Conv / pool wrappers
# -----------------------------------------------------------------------------
def _im2col(x, kh, kw, stride, padding, Ho, Wo):
    """(B,H,W,Cin) -> (B*Ho*Wo, kh*kw*Cin) patch matrix (XLA glue, bf16)."""
    B, H, W, Cin = x.shape
    xp = jnp.pad(x, ((0, 0), (padding, padding), (padding, padding), (0, 0)))
    cols = []
    for i in range(kh):
        for j in range(kw):
            sl = jax.lax.slice(
                xp, (0, i, j, 0),
                (B, i + (Ho - 1) * stride + 1, j + (Wo - 1) * stride + 1, Cin),
                (1, stride, stride, 1))
            cols.append(sl)                       # (B, Ho, Wo, Cin)
    pat = jnp.stack(cols, axis=3)                 # (B, Ho, Wo, kh*kw, Cin)
    return pat.reshape(B * Ho * Wo, kh * kw * Cin)


@functools.partial(jax.jit, static_argnames=("stride", "padding", "relu"))
def conv_bn(x, w, scale, shift, *, stride, padding, relu):
    """Conv2d (no bias) + folded BatchNorm (+ optional ReLU).  x: NHWC, w: OIHW."""
    B, H, W, Cin = x.shape
    Cout, _, kh, kw = w.shape
    Ho = (H + 2 * padding - kh) // stride + 1
    Wo = (W + 2 * padding - kw) // stride + 1
    # TODO(synk): fuse im2col into the Pallas kernel (9-tap accumulation over an
    # NHWC row strip held in VMEM) to avoid materializing the patch matrix in HBM.
    patches = _im2col(x.astype(jnp.bfloat16), kh, kw, stride, padding, Ho, Wo)
    wmat = jnp.transpose(w, (2, 3, 1, 0)).reshape(kh * kw * Cin, Cout)
    out = _matmul_bn_act(patches, wmat, scale, shift, None, relu)
    return out.reshape(B, Ho, Wo, Cout)


@functools.partial(jax.jit, static_argnames=("stride", "padding"))
def conv_bn_add_relu(x, w, scale, shift, residual, *, stride, padding):
    """Conv2d + folded BN + residual add + ReLU (second conv of a BasicBlock)."""
    B, H, W, Cin = x.shape
    Cout, _, kh, kw = w.shape
    Ho = (H + 2 * padding - kh) // stride + 1
    Wo = (W + 2 * padding - kw) // stride + 1
    patches = _im2col(x.astype(jnp.bfloat16), kh, kw, stride, padding, Ho, Wo)
    wmat = jnp.transpose(w, (2, 3, 1, 0)).reshape(kh * kw * Cin, Cout)
    res = residual.reshape(B * Ho * Wo, Cout)
    out = _matmul_bn_act(patches, wmat, scale, shift, res, True)
    return out.reshape(B, Ho, Wo, Cout)


@jax.jit
def maxpool_3x3_s2_p1(x):
    """MaxPool2d(kernel=3, stride=2, padding=1) on NHWC input, gridded over rows."""
    B, H, W, C = x.shape
    Ho = (H + 2 - 3) // 2 + 1
    Wo = (W + 2 - 3) // 2 + 1
    neg = jnp.finfo(jnp.float32).min
    xp = jnp.pad(x, ((0, 0), (1, 1), (1, 1), (0, 0)), constant_values=neg)
    wins = []
    for i in range(3):
        for j in range(3):
            sl = jax.lax.slice(
                xp, (0, i, j, 0),
                (B, i + (Ho - 1) * 2 + 1, j + (Wo - 1) * 2 + 1, C),
                (1, 2, 2, 1))
            wins.append(sl.reshape(B * Ho * Wo, C))
    M = B * Ho * Wo
    tm, Mp = _pick_tm(M)
    wins = [jnp.pad(w_, ((0, Mp - M), (0, 0))) for w_ in wins]

    def kernel(*refs):
        o_ref = refs[-1]
        acc = refs[0][...]
        for r in refs[1:-1]:
            acc = jnp.maximum(acc, r[...])
        o_ref[...] = acc

    # TODO(synk): strip-wise fused maxpool (one padded-strip DMA + shifted VMEM
    # slices) would remove the ~9x HBM read amplification of this slice form.
    out = pl.pallas_call(
        kernel,
        out_shape=jax.ShapeDtypeStruct((Mp, C), jnp.float32),
        grid=(Mp // tm,),
        in_specs=[pl.BlockSpec((tm, C), lambda i: (i, 0))] * 9,
        out_specs=pl.BlockSpec((tm, C), lambda i: (i, 0)),
        compiler_params=pltpu.CompilerParams(
            dimension_semantics=("parallel",), vmem_limit_bytes=_VMEM_LIMIT),
    )(*wins)
    return out[:M].reshape(B, Ho, Wo, C)


@jax.jit
def global_avg_pool(x):
    """AdaptiveAvgPool2d((1,1)) -> (B, C)."""
    B, H, W, C = x.shape
    xr = x.reshape(B, H * W, C)

    def kernel(x_ref, o_ref):
        o_ref[...] = jnp.mean(x_ref[...], axis=1)

    return pl.pallas_call(
        kernel, out_shape=jax.ShapeDtypeStruct((B, C), jnp.float32),
        compiler_params=pltpu.CompilerParams(vmem_limit_bytes=_VMEM_LIMIT),
    )(xr)


# -----------------------------------------------------------------------------
# Fused LSTM-layer kernel: the WHOLE ts*b_z sequence (batch=1) in one pallas_call.
# One MXU matmul for the input projection of every timestep, then a fori_loop
# recurrence with Whh resident in VMEM.  Starts from the zero state (matches
# PyTorch: first rnn() call has no initial state, later calls chain (hn, cn)).
# -----------------------------------------------------------------------------
def _lstm_seq_kernel(y_ref, wih_ref, whh_ref, b_ref, out_ref, gates_ref):
    T = y_ref.shape[0]
    Hh = whh_ref.shape[0]
    # Input projection for all T timesteps at once.
    gates_ref[...] = (jnp.dot(y_ref[...], wih_ref[...],
                              preferred_element_type=jnp.float32) + b_ref[...])

    def step(t, carry):
        h, c = carry
        g = gates_ref[pl.ds(t, 1), :] + jnp.dot(
            h, whh_ref[...], preferred_element_type=jnp.float32)
        i = jax.nn.sigmoid(g[:, 0:Hh])
        f = jax.nn.sigmoid(g[:, Hh:2 * Hh])
        gg = jnp.tanh(g[:, 2 * Hh:3 * Hh])
        o = jax.nn.sigmoid(g[:, 3 * Hh:4 * Hh])
        c_new = f * c + i * gg
        h_new = o * jnp.tanh(c_new)
        out_ref[t] = h_new                       # dynamic store on leading dim
        return (h_new, c_new)

    jax.lax.fori_loop(
        0, T, step,
        (jnp.zeros((1, Hh), jnp.float32), jnp.zeros((1, Hh), jnp.float32)))


@jax.jit
def lstm_layer_seq(y, wihT, whhT, b):
    """Run one LSTM layer over the full length-T sequence (batch=1)."""
    T = y.shape[0]
    Hh = whhT.shape[0]
    out3 = pl.pallas_call(
        _lstm_seq_kernel,
        out_shape=jax.ShapeDtypeStruct((T, 1, Hh), jnp.float32),
        scratch_shapes=[pltpu.VMEM((T, 4 * Hh), jnp.float32)],
        compiler_params=pltpu.CompilerParams(vmem_limit_bytes=_VMEM_LIMIT),
    )(y, wihT, whhT, b)
    return out3.reshape(T, Hh)


@jax.jit
def linear(x, wT, b):
    """nn.Linear: x @ W^T + b."""
    def kernel(x_ref, w_ref, b_ref, o_ref):
        o_ref[...] = (jnp.dot(x_ref[...], w_ref[...],
                              preferred_element_type=jnp.float32) + b_ref[...])
    return pl.pallas_call(
        kernel,
        out_shape=jax.ShapeDtypeStruct((x.shape[0], wT.shape[1]), jnp.float32),
        compiler_params=pltpu.CompilerParams(vmem_limit_bytes=_VMEM_LIMIT),
    )(x, wT, b)


# -----------------------------------------------------------------------------
# Parameter init (deterministic, synthetic — shapes equivalent to torchvision
# resnet18 with fc=Identity, nn.LSTM, nn.Linear)
# -----------------------------------------------------------------------------
def init_params(key, num_classes, rnn_hidden, rnn_layers):
    keys = iter(jax.random.split(key, 256))
    nk = lambda: next(keys)

    def conv_w(cout, cin, k):
        fan_in = cin * k * k
        return jax.random.normal(nk(), (cout, cin, k, k), jnp.float32) / math.sqrt(fan_in)

    def bn_params(c):
        # Fold BN (eval mode) into a per-channel affine: scale, shift.
        gamma = 1.0 + 0.1 * jax.random.normal(nk(), (c,), jnp.float32)
        beta = 0.1 * jax.random.normal(nk(), (c,), jnp.float32)
        mean = 0.1 * jax.random.normal(nk(), (c,), jnp.float32)
        var = 1.0 + 0.2 * jax.random.uniform(nk(), (c,), jnp.float32)
        scale = gamma / jnp.sqrt(var + 1e-5)
        shift = beta - mean * scale
        return scale.reshape(1, c), shift.reshape(1, c)

    resnet = {"conv1_w": conv_w(64, 3, 7), "bn1": bn_params(64), "layers": []}
    in_c = 64
    for out_c, stride in [(64, 1), (128, 2), (256, 2), (512, 2)]:
        layer = []
        for blk_i in range(2):
            s = stride if blk_i == 0 else 1
            blk = {
                "stride": s,
                "conv1_w": conv_w(out_c, in_c, 3),
                "bn1": bn_params(out_c),
                "conv2_w": conv_w(out_c, out_c, 3),
                "bn2": bn_params(out_c),
                "downsample": None,
            }
            if s != 1 or in_c != out_c:
                blk["downsample"] = (conv_w(out_c, in_c, 1),) + bn_params(out_c)
            layer.append(blk)
            in_c = out_c
        resnet["layers"].append(layer)

    num_features = 512  # resnet18 fc.in_features
    lstm = []
    inp = num_features
    for _ in range(rnn_layers):
        wih = jax.random.normal(nk(), (4 * rnn_hidden, inp), jnp.float32) * 0.05
        whh = jax.random.normal(nk(), (4 * rnn_hidden, rnn_hidden), jnp.float32) * 0.05
        bih = jax.random.normal(nk(), (4 * rnn_hidden,), jnp.float32) * 0.05
        bhh = jax.random.normal(nk(), (4 * rnn_hidden,), jnp.float32) * 0.05
        lstm.append((wih.T, whh.T, (bih + bhh).reshape(1, -1)))
        inp = rnn_hidden

    fc1_w = jax.random.normal(nk(), (num_classes, rnn_hidden), jnp.float32) * 0.05
    fc1_b = jax.random.normal(nk(), (num_classes,), jnp.float32) * 0.05

    return {
        "resnet": resnet,
        "lstm": lstm,
        "fc1_wT": fc1_w.T,
        "fc1_b": fc1_b.reshape(1, -1),
        "rnn_hidden_size": rnn_hidden,
        "rnn_num_layers": rnn_layers,
    }


# -----------------------------------------------------------------------------
# Model forward
# -----------------------------------------------------------------------------
def resnet18_features(frames_nchw, rp):
    """ResNet18 backbone (fc = Identity): (B, 3, H, W) -> (B, 512)."""
    x = jnp.transpose(frames_nchw, (0, 2, 3, 1)).astype(jnp.float32)  # NHWC
    s1, b1 = rp["bn1"]
    x = conv_bn(x, rp["conv1_w"], s1, b1, stride=2, padding=3, relu=True)
    x = maxpool_3x3_s2_p1(x)
    for layer in rp["layers"]:
        for blk in layer:
            identity = x
            out = conv_bn(x, blk["conv1_w"], blk["bn1"][0], blk["bn1"][1],
                          stride=blk["stride"], padding=1, relu=True)
            if blk["downsample"] is not None:
                dw, dsc, dsh = blk["downsample"]
                identity = conv_bn(x, dw, dsc, dsh,
                                   stride=blk["stride"], padding=0, relu=False)
            x = conv_bn_add_relu(out, blk["conv2_w"], blk["bn2"][0], blk["bn2"][1],
                                 identity, stride=1, padding=1)
    return global_avg_pool(x)  # (B, 512)


def resnt18rnn_forward(x, params):
    """x: (b_z, ts, c, h, w) -> (b_z, num_classes)."""
    b_z, ts = x.shape[0], x.shape[1]
    # 1) CNN over ALL frames at once (frame-major so feature rows line up with
    #    the LSTM's concatenated sequence order).
    frames = jnp.transpose(x, (1, 0, 2, 3, 4)).reshape((ts * b_z,) + x.shape[2:])
    y = resnet18_features(frames, params["resnet"])          # (ts*b_z, 512)
    # 2) PyTorch quirk: rnn(y.unsqueeze(1)) uses seq_len = b_z, batch = 1 and
    #    (hn, cn) chains across frames -> identical to ONE stacked-LSTM pass
    #    over the length ts*b_z concatenated sequence from the zero state.
    seq = y
    for (wihT, whhT, b) in params["lstm"]:
        seq = lstm_layer_seq(seq, wihT, whhT, b)
    out_last = seq[-b_z:]                                     # == out[:, -1]
    # Dropout: identity in eval/inference mode.
    return linear(out_last, params["fc1_wT"], params["fc1_b"])  # (b_z, num_classes)


# -----------------------------------------------------------------------------
if __name__ == "__main__":
    params_model = {
        "num_classes": 10,
        "dr_rate": 0.1,
        "pretrained": False,
        "rnn_hidden_size": 128,
        "rnn_num_layers": 1,
    }
    key = jax.random.PRNGKey(0)
    pkey, xkey = jax.random.split(key)
    params = init_params(pkey,
                         num_classes=params_model["num_classes"],
                         rnn_hidden=params_model["rnn_hidden_size"],
                         rnn_layers=params_model["rnn_num_layers"])

    # (b_z, ts, c, h, w) — resnet18 requires c = 3.
    B, T, C, Hs, Ws = 2, 4, 3, 16, 16
    x = jax.random.normal(xkey, (B, T, C, Hs, Ws), jnp.float32)

    out = resnt18rnn_forward(x, params)
    out = jax.block_until_ready(out)

    assert out.shape == (B, params_model["num_classes"]), out.shape
    assert bool(jnp.all(jnp.isfinite(out)))
    print("KERNEL_OK")
</pallas_src>

<mosaic_0001>
module attributes {stable_mosaic.version = 11 : i64} {
  func.func @kernel(%arg0: i32, %arg1: i32, %arg2: i32, %arg3: memref<512x256xbf16, #tpu.memory_space<vmem>>, %arg4: memref<256x128xbf16, #tpu.memory_space<vmem>>, %arg5: memref<1x128xf32, #tpu.memory_space<vmem>>, %arg6: memref<1x128xf32, #tpu.memory_space<vmem>>, %arg7: memref<512x128xf32, #tpu.memory_space<vmem>>, %arg8: memref<512x128xf32, #tpu.memory_space<vmem>>) attributes {dimension_semantics = [#tpu.dimension_semantics<parallel>, #tpu.dimension_semantics<parallel>, #tpu.dimension_semantics<arbitrary>], iteration_bounds = array<i64: 1, 1, 1>, scalar_prefetch = 0 : i64, scratch_operands = 1 : i64, tpu.core_type = #tpu.core_type<tc>, window_params = [{transform_indices = @transform_0, window_bounds = array<i64: 512, 256>}, {transform_indices = @transform_1, window_bounds = array<i64: 256, 128>}, {transform_indices = @transform_2, window_bounds = array<i64: 1, 128>}, {transform_indices = @transform_3, window_bounds = array<i64: 1, 128>}, {transform_indices = @transform_4, window_bounds = array<i64: 512, 128>}]} {
    %c0_i32 = arith.constant 0 : i32
    %0 = arith.cmpi eq, %arg2, %c0_i32 : i32
    %1 = arith.extui %0 : i1 to i32
    %c0_i32_0 = arith.constant 0 : i32
    %2 = arith.cmpi ne, %1, %c0_i32_0 : i32
    scf.if %2 {
      %cst_10 = arith.constant 0.000000e+00 : f32
      %12 = vector.broadcast %cst_10 : f32 to vector<512x128xf32>
      %c0_11 = arith.constant 0 : index
      %c0_12 = arith.constant 0 : index
      %13 = vector.load %arg8[%c0_11, %c0_12] : memref<512x128xf32, #tpu.memory_space<vmem>>, vector<512x128xf32>
      tpu.vector_store %arg8[%c0_11, %c0_12], %12 {strides = array<i32>} : memref<512x128xf32, #tpu.memory_space<vmem>>, vector<512x128xf32>,
    } else {
    }
    %c0 = arith.constant 0 : index
    %c0_1 = arith.constant 0 : index
    %3 = vector.load %arg8[%c0, %c0_1] : memref<512x128xf32, #tpu.memory_space<vmem>>, vector<512x128xf32>
    %c0_2 = arith.constant 0 : index
    %c0_3 = arith.constant 0 : index
    %4 = vector.load %arg3[%c0_2, %c0_3] : memref<512x256xbf16, #tpu.memory_space<vmem>>, vector<512x256xbf16>
    %c0_4 = arith.constant 0 : index
    %c0_5 = arith.constant 0 : index
    %5 = vector.load %arg4[%c0_4, %c0_5] : memref<256x128xbf16, #tpu.memory_space<vmem>>, vector<256x128xbf16>
    %cst = arith.constant dense<0.000000e+00> : vector<512x128xf32>
    %6 = tpu.matmul %4, %5, %cst {dimension_numbers = #tpu.dot_dimension_numbers<[1], [0], [0], [1], [0, 0, 1, 1], [], []>} : vector<512x256xbf16>, vector<256x128xbf16>, vector<512x128xf32> -> vector<512x128xf32>
    %7 = arith.addf %3, %6 : vector<512x128xf32>
    %c0_6 = arith.constant 0 : index
    %c0_7 = arith.constant 0 : index
    %8 = vector.load %arg8[%c0_6, %c0_7] : memref<512x128xf32, #tpu.memory_space<vmem>>, vector<512x128xf32>
    tpu.vector_store %arg8[%c0_6, %c0_7], %7 {strides = array<i32>} : memref<512x128xf32, #tpu.memory_space<vmem>>, vector<512x128xf32>,
    %c0_i32_8 = arith.constant 0 : i32
    %9 = arith.cmpi eq, %arg2, %c0_i32_8 : i32
    %10 = arith.extui %9 : i1 to i32
    %c0_i32_9 = arith.constant 0 : i32
    %11 = arith.cmpi ne, %10, %c0_i32_9 : i32
    scf.if %11 {
      %c0_10 = arith.constant 0 : index
      %c0_11 = arith.constant 0 : index
      %12 = vector.load %arg8[%c0_10, %c0_11] : memref<512x128xf32, #tpu.memory_space<vmem>>, vector<512x128xf32>
      %c0_12 = arith.constant 0 : index
      %c0_13 = arith.constant 0 : index
      %13 = vector.load %arg5[%c0_12, %c0_13] : memref<1x128xf32, #tpu.memory_space<vmem>>, vector<1x128xf32>
      %14 = vector.broadcast %13 : vector<1x128xf32> to vector<512x128xf32>
      %15 = arith.mulf %12, %14 : vector<512x128xf32>
      %c0_14 = arith.constant 0 : index
      %c0_15 = arith.constant 0 : index
      %16 = vector.load %arg6[%c0_14, %c0_15] : memref<1x128xf32, #tpu.memory_space<vmem>>, vector<1x128xf32>
      %17 = vector.broadcast %16 : vector<1x128xf32> to vector<512x128xf32>
      %18 = arith.addf %15, %17 : vector<512x128xf32>
      %cst_16 = arith.constant 0.000000e+00 : f32
      %19 = vector.broadcast %cst_16 : f32 to vector<512x128xf32>
      %20 = arith.maximumf %18, %19 : vector<512x128xf32>
      %c0_17 = arith.constant 0 : index
      %c0_18 = arith.constant 0 : index
      %21 = vector.load %arg7[%c0_17, %c0_18] : memref<512x128xf32, #tpu.memory_space<vmem>>, vector<512x128xf32>
      tpu.vector_store %arg7[%c0_17, %c0_18], %20 {strides = array<i32>} : memref<512x128xf32, #tpu.memory_space<vmem>>, vector<512x128xf32>,
    } else {
    }
    return
  }
  func.func @transform_0(%arg0: i32, %arg1: i32, %arg2: i32) -> (i32, i32) {
    %c0_i32 = arith.constant 0 : i32
    return %arg0, %arg2 : i32, i32
  }
  func.func @transform_1(%arg0: i32, %arg1: i32, %arg2: i32) -> (i32, i32) {
    %c0_i32 = arith.constant 0 : i32
    return %arg2, %arg1 : i32, i32
  }
  func.func @transform_2(%arg0: i32, %arg1: i32, %arg2: i32) -> (i32, i32) {
    %c0_i32 = arith.constant 0 : i32
    %c0_i32_0 = arith.constant 0 : i32
    return %c0_i32, %arg1 : i32, i32
  }
  func.func @transform_3(%arg0: i32, %arg1: i32, %arg2: i32) -> (i32, i32) {
    %c0_i32 = arith.constant 0 : i32
    %c0_i32_0 = arith.constant 0 : i32
    return %c0_i32, %arg1 : i32, i32
  }
  func.func @transform_4(%arg0: i32, %arg1: i32, %arg2: i32) -> (i32, i32) {
    %c0_i32 = arith.constant 0 : i32
    return %arg0, %arg1 : i32, i32
  }
}

</mosaic_0001>

<bundles_post_ra>
// kernel: conv_bn.1
= control target key start
LH: loop header
LB: loop body
LE: loop exit
PB: predicated region body
PF: predicated region fallthrough
CT: control target
= control target key end

     0   :  { %s2518_s0 = inlined_call_operand.vmem [shape: bf16[512,256], index: 0, kind: input, shape index: {}]   ;;  %s2519_s1 = inlined_call_operand.vmem [shape: bf16[256,128], index: 1, kind: input, shape index: {}]   ;;  %s2520_s2 = inlined_call_operand.vmem [shape: f32[1,128], index: 2, kind: input, shape index: {}]   ;;  %s2521_s3 = inlined_call_operand.vmem [shape: f32[1,128], index: 3, kind: input, shape index: {}]   ;;  %s2522_s4 = inlined_call_operand.hbm [shape: f32[512,128], index: 4, kind: output, shape index: {}]  }
   0x1   :  { %v1868_v0 = vld [vmem:[%s2519_s1 + $0x38] sm:$0xff]  ;;  %v1867_v2 = vld [vmem:[%s2519_s1 + $0x30] sm:$0xff]  ;;  %v1866_v4 = vld [vmem:[%s2519_s1 + $0x28] sm:$0xff] }
   0x2   :  { %v1876_v1 = vld [vmem:[%s2519_s1 + $0x78] sm:$0xff]  ;;  %662 = vmatpush.bf16.msra.mxu0 %v1868_v0  ;;  %1877 = vmatpush.bf16.msra.mxu2 %v1868_v0  ;;  %v1875_v3 = vld [vmem:[%s2519_s1 + $0x70] sm:$0xff]  ;;  %v1874_v5 = vld [vmem:[%s2519_s1 + $0x68] sm:$0xff] }
   0x3   :  { %831 = vmatpush.bf16.msra.mxu1 %v1876_v1  ;;  %1885 = vmatpush.bf16.msra.mxu3 %v1876_v1 }
   0x6   :  { %663 = vmatpush.bf16.msra.mxu0 %v1867_v2  ;;  %1878 = vmatpush.bf16.msra.mxu2 %v1867_v2 }
   0x7   :  { %832 = vmatpush.bf16.msra.mxu1 %v1875_v3  ;;  %1886 = vmatpush.bf16.msra.mxu3 %v1875_v3 }
   0x8   :  { %9 = vsyncpa [#allocation4], 0  ;;  %v1865_v6 = vld [vmem:[%s2519_s1 + $0x20] sm:$0xff]  ;;  %v1864_v8 = vld [vmem:[%s2519_s1 + $0x18] sm:$0xff]  ;;  %s1465_s16 = sshll.u32 %s2522_s4, 4  ;;  %s1927_s17 = smov 128   ;;  %s1466_s16 = int_to_ptr.hbm [resolvable:$true] %s1465_s16 }
   0x9   :  { %v1873_v7 = vld [vmem:[%s2519_s1 + $0x60] sm:$0xff]  ;;  %v1872_v9 = vld [vmem:[%s2519_s1 + $0x58] sm:$0xff]  ;;  %v1863_v10 = vld [vmem:[%s2519_s1 + $0x10] sm:$0xff]  ;;  %s1928_s18 = smov 8  }
   0xa   :  { %664 = vmatpush.bf16.msra.mxu0 %v1866_v4  ;;  %1879 = vmatpush.bf16.msra.mxu2 %v1866_v4  ;;  %v1871_v11 = vld [vmem:[%s2519_s1 + $0x50] sm:$0xff]  ;;  %v1862_v12 = vld [vmem:[%s2519_s1 + $0x8] sm:$0xff]  ;;  %v1861_v14 = vld [vmem:[%s2519_s1] sm:$0xff] }
   0xb   :  { %833 = vmatpush.bf16.msra.mxu1 %v1874_v5  ;;  %1887 = vmatpush.bf16.msra.mxu3 %v1874_v5  ;;  %v1870_v13 = vld [vmem:[%s2519_s1 + $0x48] sm:$0xff]  ;;  %v1869_v15 = vld [vmem:[%s2519_s1 + $0x40] sm:$0xff]  ;;  %v1487_v28 = vld [vmem:[%s2518_s0 + $0x10] sm:$0xf] }
   0xc   :  { %v1479_v16 = vld [vmem:[%s2518_s0] sm:$0xf]  ;;  %v1798_v17 = vld [vmem:[%s2518_s0 + $0x4] sm:$0xf0]  ;;  %v1797_v20 = vld [vmem:[%s2518_s0 + $0x4] sm:$0xf] }
   0xd   :  { %v1607_v18 = vld [vmem:[%s2518_s0 + $0x100] sm:$0xf]  ;;  %v1830_v19 = vld [vmem:[%s2518_s0 + $0x104] sm:$0xf0]  ;;  %v1481_v21 = vld [vmem:[%s2518_s0 + $0x8] sm:$0xf0]  ;;  %v1480_v24 = vor.u32 %v1798_v17, %v1479_v16 }
   0xe   :  { %665 = vmatpush.bf16.msra.mxu0 %v1865_v6  ;;  %1880 = vmatpush.bf16.msra.mxu2 %v1865_v6  ;;  %v1829_v22 = vld [vmem:[%s2518_s0 + $0x104] sm:$0xf]  ;;  %v1609_v23 = vld [vmem:[%s2518_s0 + $0x108] sm:$0xf0]  ;;  %v1608_v25 = vor.u32 %v1830_v19, %v1607_v18  ;;  %v1484_v26 = vor.u32 %v1797_v20, %v1481_v21  ;;  %v1800_v29 = vld [vmem:[%s2518_s0 + $0x14] sm:$0xf0] }
   0xf   :  { %834 = vmatpush.bf16.msra.mxu1 %v1873_v7  ;;  %1888 = vmatpush.bf16.msra.mxu3 %v1873_v7  ;;  %v1612_v27 = vor.u32 %v1829_v22, %v1609_v23  ;;  %v1615_v30 = vld [vmem:[%s2518_s0 + $0x110] sm:$0xf]  ;;  %v1832_v31 = vld [vmem:[%s2518_s0 + $0x114] sm:$0xf0]  ;;  %v1799_v32 = vld [vmem:[%s2518_s0 + $0x14] sm:$0xf]  ;;  %v1488_v36 = vor.u32 %v1800_v29, %v1487_v28 }
  0x10   :  { %v1489_v33 = vld [vmem:[%s2518_s0 + $0x18] sm:$0xf0]  ;;  %v1831_v34 = vld [vmem:[%s2518_s0 + $0x114] sm:$0xf]  ;;  %v1616_v37 = vor.u32 %v1832_v31, %v1615_v30  ;;  %v1495_v40 = vld [vmem:[%s2518_s0 + $0x20] sm:$0xf] }
  0x11   :  { %v1617_v35 = vld [vmem:[%s2518_s0 + $0x118] sm:$0xf0]  ;;  %v1492_v38 = vor.u32 %v1799_v32, %v1489_v33  ;;  %v1802_v41 = vld [vmem:[%s2518_s0 + $0x24] sm:$0xf0]  ;;  %v1623_v42 = vld [vmem:[%s2518_s0 + $0x120] sm:$0xf] }
  0x12   :  { %666 = vmatpush.bf16.msra.mxu0 %v1864_v8  ;;  %1881 = vmatpush.bf16.msra.mxu2 %v1864_v8  ;;  %v1620_v39 = vor.u32 %v1831_v34, %v1617_v35  ;;  %v1834_v43 = vld [vmem:[%s2518_s0 + $0x124] sm:$0xf0]  ;;  %v1801_v44 = vld [vmem:[%s2518_s0 + $0x24] sm:$0xf]  ;;  %v1497_v45 = vld [vmem:[%s2518_s0 + $0x28] sm:$0xf0]  ;;  %v1496_v48 = vor.u32 %v1802_v41, %v1495_v40 }
  0x13   :  { %835 = vmatpush.bf16.msra.mxu1 %v1872_v9  ;;  %1889 = vmatpush.bf16.msra.mxu3 %v1872_v9  ;;  %v1833_v46 = vld [vmem:[%s2518_s0 + $0x124] sm:$0xf]  ;;  %v1625_v47 = vld [vmem:[%s2518_s0 + $0x128] sm:$0xf0]  ;;  %v1624_v49 = vor.u32 %v1834_v43, %v1623_v42  ;;  %v1500_v50 = vor.u32 %v1801_v44, %v1497_v45  ;;  %v1503_v52 = vld [vmem:[%s2518_s0 + $0x30] sm:$0xf] }
  0x14   :  { %v1628_v51 = vor.u32 %v1833_v46, %v1625_v47  ;;  %v1804_v53 = vld [vmem:[%s2518_s0 + $0x34] sm:$0xf0]  ;;  %v1631_v54 = vld [vmem:[%s2518_s0 + $0x130] sm:$0xf]  ;;  %v1803_v56 = vld [vmem:[%s2518_s0 + $0x34] sm:$0xf] }
  0x15   :  { %v1836_v55 = vld [vmem:[%s2518_s0 + $0x134] sm:$0xf0]  ;;  %v1505_v57 = vld [vmem:[%s2518_s0 + $0x38] sm:$0xf0]  ;;  %v1835_v58 = vld [vmem:[%s2518_s0 + $0x134] sm:$0xf]  ;;  %v1504_v60 = vor.u32 %v1804_v53, %v1503_v52 }
  0x16   :  { %667 = vmatpush.bf16.msra.mxu0 %v1863_v10  ;;  %1882 = vmatpush.bf16.msra.mxu2 %v1863_v10  ;;  %v1633_v59 = vld [vmem:[%s2518_s0 + $0x138] sm:$0xf0]  ;;  %v1632_v61 = vor.u32 %v1836_v55, %v1631_v54  ;;  %v1508_v62 = vor.u32 %v1803_v56, %v1505_v57  ;;  %v1511_v0 = vld [vmem:[%s2518_s0 + $0x40] sm:$0xf]  ;;  %v1806_v1 = vld [vmem:[%s2518_s0 + $0x44] sm:$0xf0] }
  0x17   :  { %836 = vmatpush.bf16.msra.mxu1 %v1871_v11  ;;  %1890 = vmatpush.bf16.msra.mxu3 %v1871_v11  ;;  %v1636_v63 = vor.u32 %v1835_v58, %v1633_v59  ;;  %v1639_v2 = vld [vmem:[%s2518_s0 + $0x140] sm:$0xf]  ;;  %v1838_v3 = vld [vmem:[%s2518_s0 + $0x144] sm:$0xf0]  ;;  %v1805_v4 = vld [vmem:[%s2518_s0 + $0x44] sm:$0xf]  ;;  %v1512_v8 = vor.u32 %v1806_v1, %v1511_v0 }
  0x18   :  { %v1513_v5 = vld [vmem:[%s2518_s0 + $0x48] sm:$0xf0]  ;;  %v1837_v6 = vld [vmem:[%s2518_s0 + $0x144] sm:$0xf]  ;;  %v1640_v9 = vor.u32 %v1838_v3, %v1639_v2  ;;  %v1807_v16 = vld [vmem:[%s2518_s0 + $0x54] sm:$0xf] }
  0x19   :  { %v1641_v7 = vld [vmem:[%s2518_s0 + $0x148] sm:$0xf0]  ;;  %v1516_v10 = vor.u32 %v1805_v4, %v1513_v5  ;;  %v1521_v17 = vld [vmem:[%s2518_s0 + $0x58] sm:$0xf0]  ;;  %v1839_v18 = vld [vmem:[%s2518_s0 + $0x154] sm:$0xf] }
  0x1a   :  { %668 = vmatpush.bf16.msra.mxu0 %v1862_v12  ;;  %1883 = vmatpush.bf16.msra.mxu2 %v1862_v12  ;;  %v1644_v11 = vor.u32 %v1837_v6, %v1641_v7  ;;  %v1519_v12 = vld [vmem:[%s2518_s0 + $0x50] sm:$0xf]  ;;  %v1649_v19 = vld [vmem:[%s2518_s0 + $0x158] sm:$0xf0]  ;;  %v1524_v22 = vor.u32 %v1807_v16, %v1521_v17  ;;  %v1809_v28 = vld [vmem:[%s2518_s0 + $0x64] sm:$0xf] }
  0x1b   :  { %837 = vmatpush.bf16.msra.mxu1 %v1870_v13  ;;  %1891 = vmatpush.bf16.msra.mxu3 %v1870_v13  ;;  %v1808_v13 = vld [vmem:[%s2518_s0 + $0x54] sm:$0xf0]  ;;  %v1652_v23 = vor.u32 %v1839_v18, %v1649_v19  ;;  %v1529_v29 = vld [vmem:[%s2518_s0 + $0x68] sm:$0xf0]  ;;  %v1841_v30 = vld [vmem:[%s2518_s0 + $0x164] sm:$0xf] }
  0x1c   :  { %v1520_v20 = vor.u32 %v1808_v13, %v1519_v12  ;;  %v1657_v31 = vld [vmem:[%s2518_s0 + $0x168] sm:$0xf0]  ;;  %v1532_v34 = vor.u32 %v1809_v28, %v1529_v29  ;;  %v1811_v40 = vld [vmem:[%s2518_s0 + $0x74] sm:$0xf]  ;;  %v1537_v41 = vld [vmem:[%s2518_s0 + $0x78] sm:$0xf0] }
  0x1d   :  { %v1660_v35 = vor.u32 %v1841_v30, %v1657_v31  ;;  %v1843_v42 = vld [vmem:[%s2518_s0 + $0x174] sm:$0xf]  ;;  %v1665_v43 = vld [vmem:[%s2518_s0 + $0x178] sm:$0xf0]  ;;  %v1540_v46 = vor.u32 %v1811_v40, %v1537_v41  ;;  %v1813_v52 = vld [vmem:[%s2518_s0 + $0x84] sm:$0xf] }
  0x1e   :  { %669 = vmatpush.bf16.msra.mxu0 %v1861_v14  ;;  %1884 = vmatpush.bf16.msra.mxu2 %v1861_v14  ;;  %v1647_v14 = vld [vmem:[%s2518_s0 + $0x150] sm:$0xf]  ;;  %v1668_v47 = vor.u32 %v1843_v42, %v1665_v43  ;;  %v1545_v53 = vld [vmem:[%s2518_s0 + $0x88] sm:$0xf0]  ;;  %v1845_v54 = vld [vmem:[%s2518_s0 + $0x184] sm:$0xf] }
  0x1f   :  { %838 = vmatpush.bf16.msra.mxu1 %v1869_v15  ;;  %1892 = vmatpush.bf16.msra.mxu3 %v1869_v15  ;;  %v1840_v15 = vld [vmem:[%s2518_s0 + $0x154] sm:$0xf0]  ;;  %v1673_v55 = vld [vmem:[%s2518_s0 + $0x188] sm:$0xf0]  ;;  %v2221_v59 = vld [vmem:[%s2520_s2] ss:$0 sm:$0xff] }
  0x20   :  { %v1648_v21 = vor.u32 %v1840_v15, %v1647_v14  ;;  %v2226_v0 = vld [vmem:[%s2521_s3] ss:$0 sm:$0xff]  ;;  %v1816_v12 = vld [vmem:[%s2518_s0 + $0x94] sm:$0xf0]  ;;  %v1679_v15 = vld [vmem:[%s2518_s0 + $0x190] sm:$0xf] }
  0x21   :  { %670 = vmatmul.bf16.vlgmr.msra.gmra.mxu0 %v1480_v24  ;;  %750 = vmatmul.bf16.vlgmr.msra.gmra.mxu2 %v1608_v25  ;;  %v1527_v24 = vld [vmem:[%s2518_s0 + $0x60] sm:$0xf]  ;;  %v1810_v25 = vld [vmem:[%s2518_s0 + $0x64] sm:$0xf0]  ;;  %v1848_v16 = vld [vmem:[%s2518_s0 + $0x194] sm:$0xf0] }
  0x22   :  { %839 = vmatmul.bf16.vlgmr.msra.gmra.mxu1 %v1484_v26  ;;  %919 = vmatmul.bf16.vlgmr.msra.gmra.mxu3 %v1612_v27  ;;  %v1655_v26 = vld [vmem:[%s2518_s0 + $0x160] sm:$0xf]  ;;  %v1842_v27 = vld [vmem:[%s2518_s0 + $0x164] sm:$0xf0]  ;;  %v1528_v32 = vor.u32 %v1810_v25, %v1527_v24  ;;  %v1815_v17 = vld [vmem:[%s2518_s0 + $0x94] sm:$0xf] }
  0x23   :  { %v1656_v33 = vor.u32 %v1842_v27, %v1655_v26  ;;  %v1553_v18 = vld [vmem:[%s2518_s0 + $0x98] sm:$0xf0]  ;;  %v1847_v19 = vld [vmem:[%s2518_s0 + $0x194] sm:$0xf]  ;;  %v1680_v26 = vor.u32 %v1848_v16, %v1679_v15 }
  0x24   :  { %v1556_v30 = vor.u32 %v1815_v17, %v1553_v18 }
  0x31   :  { %675 = vmatmul.bf16.gmra.mxu0 %v1488_v36  ;;  %755 = vmatmul.bf16.gmra.mxu2 %v1616_v37  ;;  %v1535_v36 = vld [vmem:[%s2518_s0 + $0x70] sm:$0xf]  ;;  %v1812_v37 = vld [vmem:[%s2518_s0 + $0x74] sm:$0xf0] }
  0x32   :  { %844 = vmatmul.bf16.gmra.mxu1 %v1492_v38  ;;  %924 = vmatmul.bf16.gmra.mxu3 %v1620_v39  ;;  %v1663_v38 = vld [vmem:[%s2518_s0 + $0x170] sm:$0xf]  ;;  %v1844_v39 = vld [vmem:[%s2518_s0 + $0x174] sm:$0xf0]  ;;  %v1536_v44 = vor.u32 %v1812_v37, %v1535_v36 }
  0x33   :  { %v1664_v45 = vor.u32 %v1844_v39, %v1663_v38 }
  0x41   :  { %680 = vmatmul.bf16.gmra.mxu0 %v1496_v48  ;;  %760 = vmatmul.bf16.gmra.mxu2 %v1624_v49  ;;  %v1543_v48 = vld [vmem:[%s2518_s0 + $0x80] sm:$0xf]  ;;  %v1814_v49 = vld [vmem:[%s2518_s0 + $0x84] sm:$0xf0] }
  0x42   :  { %849 = vmatmul.bf16.gmra.mxu1 %v1500_v50  ;;  %929 = vmatmul.bf16.gmra.mxu3 %v1628_v51  ;;  %v1671_v50 = vld [vmem:[%s2518_s0 + $0x180] sm:$0xf]  ;;  %v1846_v51 = vld [vmem:[%s2518_s0 + $0x184] sm:$0xf0]  ;;  %v1544_v56 = vor.u32 %v1814_v49, %v1543_v48 }
  0x43   :  { %v1672_v57 = vor.u32 %v1846_v51, %v1671_v50  ;;  %v1818_v48 = vld [vmem:[%s2518_s0 + $0xa4] sm:$0xf0]  ;;  %v1687_v51 = vld [vmem:[%s2518_s0 + $0x1a0] sm:$0xf] }
  0x51   :  { %685 = vmatmul.bf16.gmra.mxu0 %v1504_v60  ;;  %765 = vmatmul.bf16.gmra.mxu2 %v1632_v61  ;;  %v1548_v60 = vor.u32 %v1813_v52, %v1545_v53  ;;  %v1676_v61 = vor.u32 %v1845_v54, %v1673_v55  ;;  %v1850_v52 = vld [vmem:[%s2518_s0 + $0x1a4] sm:$0xf0]  ;;  %v1817_v53 = vld [vmem:[%s2518_s0 + $0xa4] sm:$0xf]  ;;  %v1561_v54 = vld [vmem:[%s2518_s0 + $0xa8] sm:$0xf0] }
  0x52   :  { %854 = vmatmul.bf16.gmra.mxu1 %v1508_v62  ;;  %934 = vmatmul.bf16.gmra.mxu3 %v1636_v63  ;;  %v1849_v55 = vld [vmem:[%s2518_s0 + $0x1a4] sm:$0xf] }
  0x61   :  { %690 = vmatmul.bf16.gmra.mxu0 %v1512_v8  ;;  %770 = vmatmul.bf16.gmra.mxu2 %v1640_v9 }
  0x62   :  { %859 = vmatmul.bf16.gmra.mxu1 %v1516_v10  ;;  %939 = vmatmul.bf16.gmra.mxu3 %v1644_v11  ;;  %v1551_v11 = vld [vmem:[%s2518_s0 + $0x90] sm:$0xf] }
  0x63   :  { %v1552_v25 = vor.u32 %v1816_v12, %v1551_v11 }
  0x71   :  { %695 = vmatmul.bf16.gmra.mxu0 %v1520_v20  ;;  %775 = vmatmul.bf16.gmra.mxu2 %v1648_v21  ;;  %v1681_v20 = vld [vmem:[%s2518_s0 + $0x198] sm:$0xf0] }
  0x72   :  { %864 = vmatmul.bf16.gmra.mxu1 %v1524_v22  ;;  %944 = vmatmul.bf16.gmra.mxu3 %v1652_v23  ;;  %v1684_v31 = vor.u32 %v1847_v19, %v1681_v20 }
  0x81   :  { %700 = vmatmul.bf16.gmra.mxu0 %v1528_v32  ;;  %780 = vmatmul.bf16.gmra.mxu2 %v1656_v33 }
  0x82   :  { %869 = vmatmul.bf16.gmra.mxu1 %v1532_v34  ;;  %949 = vmatmul.bf16.gmra.mxu3 %v1660_v35 }
  0x91   :  { %705 = vmatmul.bf16.gmra.mxu0 %v1536_v44  ;;  %785 = vmatmul.bf16.gmra.mxu2 %v1664_v45 }
  0x92   :  { %874 = vmatmul.bf16.gmra.mxu1 %v1540_v46  ;;  %954 = vmatmul.bf16.gmra.mxu3 %v1668_v47  ;;  %v1559_v47 = vld [vmem:[%s2518_s0 + $0xa0] sm:$0xf] }
  0x9e   :  { %v671_v58 = vpop.f32.mrf.mxu0 }
  0x9f   :  { %v840_v62 = vpop.f32.mrf.mxu1 }
  0xa0   :  { %v841_v63 = vadd.f32 %v840_v62, %v671_v58  ;;  %v1560_v62 = vor.u32 %v1818_v48, %v1559_v47 }
  0xa1   :  { %710 = vmatmul.bf16.gmra.mxu0 %v1544_v56  ;;  %790 = vmatmul.bf16.gmra.mxu2 %v1672_v57  ;;  %v1689_v56 = vld [vmem:[%s2518_s0 + $0x1a8] sm:$0xf0] }
  0xa2   :  { %v1199_v1 = vmul.f32 %v2221_v59, %v841_v63  ;;  %879 = vmatmul.bf16.gmra.mxu1 %v1548_v60  ;;  %959 = vmatmul.bf16.gmra.mxu3 %v1676_v61  ;;  %v1688_v63 = vor.u32 %v1850_v52, %v1687_v51 }
  0xa4   :  { %v1267_v2 = vadd.f32 %v2226_v0, %v1199_v1  ;;  %v751_v3 = vpop.f32.mrf.mxu2 }
  0xa5   :  { %v920_v4 = vpop.f32.mrf.mxu3 }
  0xa6   :  { %v1331_v5 = vmax.f32 %v1267_v2, 0.0  ;;  %v921_v6 = vadd.f32 %v920_v4, %v751_v3  ;;  %v673_v7 = vpop.f32.mrf.mxu0  ;;  %v1564_v4 = vor.u32 %v1817_v53, %v1561_v54 }
  0xa7   :  { %v842_v8 = vpop.f32.mrf.mxu1 }
  0xa8   :  { %1395 = vst [vmem:[#allocation3] sm:$0xff] %v1331_v5  ;;  %v1231_v9 = vmul.f32 %v2221_v59, %v921_v6  ;;  %v843_v10 = vadd.f32 %v842_v8, %v673_v7  ;;  %v1692_v5 = vor.u32 %v1849_v55, %v1689_v56 }
  0xaa   :  { %v1299_v13 = vadd.f32 %v2226_v0, %v1231_v9  ;;  %v1200_v14 = vmul.f32 %v2221_v59, %v843_v10 }
  0xac   :  { %v1363_v21 = vmax.f32 %v1299_v13, 0.0  ;;  %v1268_v22 = vadd.f32 %v2226_v0, %v1200_v14  ;;  %v753_v23 = vpop.f32.mrf.mxu2 }
  0xad   :  { %v922_v24 = vpop.f32.mrf.mxu3 }
  0xae   :  { %1427 = vst [vmem:[#allocation3 + $0x100] sm:$0xff] %v1363_v21  ;;  %v1332_v27 = vmax.f32 %v1268_v22, 0.0  ;;  %v923_v28 = vadd.f32 %v922_v24, %v753_v23  ;;  %v676_v29 = vpop.f32.mrf.mxu0  ;;  %v1567_v21 = vld [vmem:[%s2518_s0 + $0xb0] sm:$0xf]  ;;  %v1820_v22 = vld [vmem:[%s2518_s0 + $0xb4] sm:$0xf0] }
  0xaf   :  { %v845_v32 = vpop.f32.mrf.mxu1 }
  0xb0   :  { %1396 = vst [vmem:[#allocation3 + $0x8] sm:$0xff] %v1332_v27  ;;  %v1232_v33 = vmul.f32 %v2221_v59, %v923_v28  ;;  %v846_v34 = vadd.f32 %v845_v32, %v676_v29  ;;  %v1819_v27 = vld [vmem:[%s2518_s0 + $0xb4] sm:$0xf]  ;;  %v1569_v28 = vld [vmem:[%s2518_s0 + $0xb8] sm:$0xf0] }
  0xb1   :  { %715 = vmatmul.bf16.gmra.mxu0 %v1552_v25  ;;  %795 = vmatmul.bf16.gmra.mxu2 %v1680_v26  ;;  %v1695_v25 = vld [vmem:[%s2518_s0 + $0x1b0] sm:$0xf]  ;;  %v1852_v26 = vld [vmem:[%s2518_s0 + $0x1b4] sm:$0xf0]  ;;  %v1851_v29 = vld [vmem:[%s2518_s0 + $0x1b4] sm:$0xf] }
  0xb2   :  { %v1300_v35 = vadd.f32 %v2226_v0, %v1232_v33  ;;  %v1201_v36 = vmul.f32 %v2221_v59, %v846_v34  ;;  %884 = vmatmul.bf16.gmra.mxu1 %v1556_v30  ;;  %964 = vmatmul.bf16.gmra.mxu3 %v1684_v31  ;;  %v1697_v30 = vld [vmem:[%s2518_s0 + $0x1b8] sm:$0xf0] }
  0xb4   :  { %v1364_v37 = vmax.f32 %v1300_v35, 0.0  ;;  %v1269_v38 = vadd.f32 %v2226_v0, %v1201_v36  ;;  %v756_v39 = vpop.f32.mrf.mxu2  ;;  %v1568_v35 = vor.u32 %v1820_v22, %v1567_v21  ;;  %v1696_v36 = vor.u32 %v1852_v26, %v1695_v25 }
  0xb5   :  { %v925_v40 = vpop.f32.mrf.mxu3 }
  0xb6   :  { %1428 = vst [vmem:[#allocation3 + $0x108] sm:$0xff] %v1364_v37  ;;  %v1333_v41 = vmax.f32 %v1269_v38, 0.0  ;;  %v926_v42 = vadd.f32 %v925_v40, %v756_v39  ;;  %v678_v43 = vpop.f32.mrf.mxu0  ;;  %v1572_v40 = vor.u32 %v1819_v27, %v1569_v28 }
  0xb7   :  { %v847_v44 = vpop.f32.mrf.mxu1 }
  0xb8   :  { %1397 = vst [vmem:[#allocation3 + $0x10] sm:$0xff] %v1333_v41  ;;  %v1233_v45 = vmul.f32 %v2221_v59, %v926_v42  ;;  %v848_v46 = vadd.f32 %v847_v44, %v678_v43  ;;  %v1700_v41 = vor.u32 %v1851_v29, %v1697_v30 }
  0xba   :  { %v1301_v49 = vadd.f32 %v2226_v0, %v1233_v45  ;;  %v1202_v50 = vmul.f32 %v2221_v59, %v848_v46 }
  0xbc   :  { %v1365_v57 = vmax.f32 %v1301_v49, 0.0  ;;  %v1270_v58 = vadd.f32 %v2226_v0, %v1202_v50  ;;  %v758_v60 = vpop.f32.mrf.mxu2 }
  0xbd   :  { %v927_v61 = vpop.f32.mrf.mxu3 }
  0xbe   :  { %1429 = vst [vmem:[#allocation3 + $0x110] sm:$0xff] %v1365_v57  ;;  %v1334_v1 = vmax.f32 %v1270_v58, 0.0  ;;  %v928_v2 = vadd.f32 %v927_v61, %v758_v60  ;;  %v681_v3 = vpop.f32.mrf.mxu0  ;;  %v1575_v57 = vld [vmem:[%s2518_s0 + $0xc0] sm:$0xf]  ;;  %v1822_v58 = vld [vmem:[%s2518_s0 + $0xc4] sm:$0xf0] }
  0xbf   :  { %v850_v6 = vpop.f32.mrf.mxu1 }
  0xc0   :  { %1398 = vst [vmem:[#allocation3 + $0x18] sm:$0xff] %v1334_v1  ;;  %v1234_v7 = vmul.f32 %v2221_v59, %v928_v2  ;;  %v851_v8 = vadd.f32 %v850_v6, %v681_v3  ;;  %v1821_v1 = vld [vmem:[%s2518_s0 + $0xc4] sm:$0xf]  ;;  %v1577_v2 = vld [vmem:[%s2518_s0 + $0xc8] sm:$0xf0] }
  0xc1   :  { %720 = vmatmul.bf16.gmra.mxu0 %v1560_v62  ;;  %800 = vmatmul.bf16.gmra.mxu2 %v1688_v63  ;;  %v1703_v62 = vld [vmem:[%s2518_s0 + $0x1c0] sm:$0xf]  ;;  %v1854_v63 = vld [vmem:[%s2518_s0 + $0x1c4] sm:$0xf0]  ;;  %v1853_v3 = vld [vmem:[%s2518_s0 + $0x1c4] sm:$0xf] }
  0xc2   :  { %v1302_v9 = vadd.f32 %v2226_v0, %v1234_v7  ;;  %v1203_v10 = vmul.f32 %v2221_v59, %v851_v8  ;;  %889 = vmatmul.bf16.gmra.mxu1 %v1564_v4  ;;  %969 = vmatmul.bf16.gmra.mxu3 %v1692_v5  ;;  %v1705_v4 = vld [vmem:[%s2518_s0 + $0x1c8] sm:$0xf0] }
  0xc4   :  { %v1366_v11 = vmax.f32 %v1302_v9, 0.0  ;;  %v1271_v12 = vadd.f32 %v2226_v0, %v1203_v10  ;;  %v761_v13 = vpop.f32.mrf.mxu2  ;;  %v1576_v9 = vor.u32 %v1822_v58, %v1575_v57  ;;  %v1704_v10 = vor.u32 %v1854_v63, %v1703_v62 }
  0xc5   :  { %v930_v14 = vpop.f32.mrf.mxu3 }
  0xc6   :  { %1430 = vst [vmem:[#allocation3 + $0x118] sm:$0xff] %v1366_v11  ;;  %v1335_v15 = vmax.f32 %v1271_v12, 0.0  ;;  %v931_v16 = vadd.f32 %v930_v14, %v761_v13  ;;  %v683_v17 = vpop.f32.mrf.mxu0  ;;  %v1580_v14 = vor.u32 %v1821_v1, %v1577_v2 }
  0xc7   :  { %v852_v18 = vpop.f32.mrf.mxu1 }
  0xc8   :  { %1399 = vst [vmem:[#allocation3 + $0x20] sm:$0xff] %v1335_v15  ;;  %v1235_v19 = vmul.f32 %v2221_v59, %v931_v16  ;;  %v853_v20 = vadd.f32 %v852_v18, %v683_v17  ;;  %v1708_v15 = vor.u32 %v1853_v3, %v1705_v4 }
  0xca   :  { %v1303_v23 = vadd.f32 %v2226_v0, %v1235_v19  ;;  %v1204_v24 = vmul.f32 %v2221_v59, %v853_v20 }
  0xcc   :  { %v1367_v31 = vmax.f32 %v1303_v23, 0.0  ;;  %v1272_v32 = vadd.f32 %v2226_v0, %v1204_v24  ;;  %v763_v33 = vpop.f32.mrf.mxu2 }
  0xcd   :  { %v932_v34 = vpop.f32.mrf.mxu3 }
  0xce   :  { %1431 = vst [vmem:[#allocation3 + $0x120] sm:$0xff] %v1367_v31  ;;  %v1336_v37 = vmax.f32 %v1272_v32, 0.0  ;;  %v933_v38 = vadd.f32 %v932_v34, %v763_v33  ;;  %v686_v39 = vpop.f32.mrf.mxu0  ;;  %v1583_v31 = vld [vmem:[%s2518_s0 + $0xd0] sm:$0xf]  ;;  %v1824_v32 = vld [vmem:[%s2518_s0 + $0xd4] sm:$0xf0] }
  0xcf   :  { %v855_v42 = vpop.f32.mrf.mxu1 }
  0xd0   :  { %1400 = vst [vmem:[#allocation3 + $0x28] sm:$0xff] %v1336_v37  ;;  %v1236_v43 = vmul.f32 %v2221_v59, %v933_v38  ;;  %v856_v44 = vadd.f32 %v855_v42, %v686_v39  ;;  %v1823_v37 = vld [vmem:[%s2518_s0 + $0xd4] sm:$0xf]  ;;  %v1585_v38 = vld [vmem:[%s2518_s0 + $0xd8] sm:$0xf0] }
  0xd1   :  { %725 = vmatmul.bf16.gmra.mxu0 %v1568_v35  ;;  %805 = vmatmul.bf16.gmra.mxu2 %v1696_v36  ;;  %v1711_v35 = vld [vmem:[%s2518_s0 + $0x1d0] sm:$0xf]  ;;  %v1856_v36 = vld [vmem:[%s2518_s0 + $0x1d4] sm:$0xf0]  ;;  %v1855_v39 = vld [vmem:[%s2518_s0 + $0x1d4] sm:$0xf] }
  0xd2   :  { %v1304_v45 = vadd.f32 %v2226_v0, %v1236_v43  ;;  %v1205_v46 = vmul.f32 %v2221_v59, %v856_v44  ;;  %894 = vmatmul.bf16.gmra.mxu1 %v1572_v40  ;;  %974 = vmatmul.bf16.gmra.mxu3 %v1700_v41  ;;  %v1713_v40 = vld [vmem:[%s2518_s0 + $0x1d8] sm:$0xf0] }
  0xd4   :  { %v1368_v47 = vmax.f32 %v1304_v45, 0.0  ;;  %v1273_v48 = vadd.f32 %v2226_v0, %v1205_v46  ;;  %v766_v49 = vpop.f32.mrf.mxu2  ;;  %v1584_v45 = vor.u32 %v1824_v32, %v1583_v31  ;;  %v1712_v46 = vor.u32 %v1856_v36, %v1711_v35 }
  0xd5   :  { %v935_v50 = vpop.f32.mrf.mxu3 }
  0xd6   :  { %1432 = vst [vmem:[#allocation3 + $0x128] sm:$0xff] %v1368_v47  ;;  %v1337_v51 = vmax.f32 %v1273_v48, 0.0  ;;  %v936_v52 = vadd.f32 %v935_v50, %v766_v49  ;;  %v688_v53 = vpop.f32.mrf.mxu0  ;;  %v1588_v50 = vor.u32 %v1823_v37, %v1585_v38 }
  0xd7   :  { %v857_v54 = vpop.f32.mrf.mxu1 }
  0xd8   :  { %1401 = vst [vmem:[#allocation3 + $0x30] sm:$0xff] %v1337_v51  ;;  %v1237_v55 = vmul.f32 %v2221_v59, %v936_v52  ;;  %v858_v56 = vadd.f32 %v857_v54, %v688_v53  ;;  %v1716_v51 = vor.u32 %v1855_v39, %v1713_v40 }
  0xda   :  { %v1305_v60 = vadd.f32 %v2226_v0, %v1237_v55  ;;  %v1206_v61 = vmul.f32 %v2221_v59, %v858_v56 }
  0xdc   :  { %v1369_v5 = vmax.f32 %v1305_v60, 0.0  ;;  %v1274_v6 = vadd.f32 %v2226_v0, %v1206_v61  ;;  %v768_v7 = vpop.f32.mrf.mxu2 }
  0xdd   :  { %v937_v8 = vpop.f32.mrf.mxu3 }
  0xde   :  { %1433 = vst [vmem:[#allocation3 + $0x130] sm:$0xff] %v1369_v5  ;;  %v1338_v11 = vmax.f32 %v1274_v6, 0.0  ;;  %v938_v12 = vadd.f32 %v937_v8, %v768_v7  ;;  %v691_v13 = vpop.f32.mrf.mxu0  ;;  %v1591_v5 = vld [vmem:[%s2518_s0 + $0xe0] sm:$0xf]  ;;  %v1826_v6 = vld [vmem:[%s2518_s0 + $0xe4] sm:$0xf0] }
  0xdf   :  { %v860_v16 = vpop.f32.mrf.mxu1 }
  0xe0   :  { %1402 = vst [vmem:[#allocation3 + $0x38] sm:$0xff] %v1338_v11  ;;  %v1238_v17 = vmul.f32 %v2221_v59, %v938_v12  ;;  %v861_v18 = vadd.f32 %v860_v16, %v691_v13  ;;  %v1825_v11 = vld [vmem:[%s2518_s0 + $0xe4] sm:$0xf]  ;;  %v1593_v12 = vld [vmem:[%s2518_s0 + $0xe8] sm:$0xf0] }
  0xe1   :  { %730 = vmatmul.bf16.gmra.mxu0 %v1576_v9  ;;  %810 = vmatmul.bf16.gmra.mxu2 %v1704_v10  ;;  %v1719_v9 = vld [vmem:[%s2518_s0 + $0x1e0] sm:$0xf]  ;;  %v1858_v10 = vld [vmem:[%s2518_s0 + $0x1e4] sm:$0xf0]  ;;  %v1857_v13 = vld [vmem:[%s2518_s0 + $0x1e4] sm:$0xf] }
  0xe2   :  { %v1306_v19 = vadd.f32 %v2226_v0, %v1238_v17  ;;  %v1207_v20 = vmul.f32 %v2221_v59, %v861_v18  ;;  %899 = vmatmul.bf16.gmra.mxu1 %v1580_v14  ;;  %979 = vmatmul.bf16.gmra.mxu3 %v1708_v15  ;;  %v1721_v14 = vld [vmem:[%s2518_s0 + $0x1e8] sm:$0xf0] }
  0xe4   :  { %v1370_v21 = vmax.f32 %v1306_v19, 0.0  ;;  %v1275_v22 = vadd.f32 %v2226_v0, %v1207_v20  ;;  %v771_v23 = vpop.f32.mrf.mxu2  ;;  %v1592_v19 = vor.u32 %v1826_v6, %v1591_v5  ;;  %v1720_v20 = vor.u32 %v1858_v10, %v1719_v9 }
  0xe5   :  { %v940_v24 = vpop.f32.mrf.mxu3 }
  0xe6   :  { %1434 = vst [vmem:[#allocation3 + $0x138] sm:$0xff] %v1370_v21  ;;  %v1339_v25 = vmax.f32 %v1275_v22, 0.0  ;;  %v941_v26 = vadd.f32 %v940_v24, %v771_v23  ;;  %v693_v27 = vpop.f32.mrf.mxu0  ;;  %v1596_v24 = vor.u32 %v1825_v11, %v1593_v12 }
  0xe7   :  { %v862_v28 = vpop.f32.mrf.mxu1 }
  0xe8   :  { %1403 = vst [vmem:[#allocation3 + $0x40] sm:$0xff] %v1339_v25  ;;  %v1239_v29 = vmul.f32 %v2221_v59, %v941_v26  ;;  %v863_v30 = vadd.f32 %v862_v28, %v693_v27  ;;  %v1724_v25 = vor.u32 %v1857_v13, %v1721_v14 }
  0xea   :  { %v1307_v33 = vadd.f32 %v2226_v0, %v1239_v29  ;;  %v1208_v34 = vmul.f32 %v2221_v59, %v863_v30 }
  0xec   :  { %v1371_v41 = vmax.f32 %v1307_v33, 0.0  ;;  %v1276_v42 = vadd.f32 %v2226_v0, %v1208_v34  ;;  %v773_v43 = vpop.f32.mrf.mxu2 }
  0xed   :  { %v942_v44 = vpop.f32.mrf.mxu3 }
  0xee   :  { %1435 = vst [vmem:[#allocation3 + $0x140] sm:$0xff] %v1371_v41  ;;  %v1340_v47 = vmax.f32 %v1276_v42, 0.0  ;;  %v943_v48 = vadd.f32 %v942_v44, %v773_v43  ;;  %v696_v49 = vpop.f32.mrf.mxu0  ;;  %v1599_v41 = vld [vmem:[%s2518_s0 + $0xf0] sm:$0xf]  ;;  %v1828_v42 = vld [vmem:[%s2518_s0 + $0xf4] sm:$0xf0] }
  0xef   :  { %v865_v52 = vpop.f32.mrf.mxu1 }
  0xf0   :  { %1404 = vst [vmem:[#allocation3 + $0x48] sm:$0xff] %v1340_v47  ;;  %v1240_v53 = vmul.f32 %v2221_v59, %v943_v48  ;;  %v866_v54 = vadd.f32 %v865_v52, %v696_v49  ;;  %v1827_v47 = vld [vmem:[%s2518_s0 + $0xf4] sm:$0xf]  ;;  %v1601_v48 = vld [vmem:[%s2518_s0 + $0xf8] sm:$0xf0] }
  0xf1   :  { %735 = vmatmul.bf16.gmra.mxu0 %v1584_v45  ;;  %815 = vmatmul.bf16.gmra.mxu2 %v1712_v46  ;;  %v1727_v45 = vld [vmem:[%s2518_s0 + $0x1f0] sm:$0xf]  ;;  %v1860_v46 = vld [vmem:[%s2518_s0 + $0x1f4] sm:$0xf0]  ;;  %v1859_v49 = vld [vmem:[%s2518_s0 + $0x1f4] sm:$0xf] }
  0xf2   :  { %v1308_v55 = vadd.f32 %v2226_v0, %v1240_v53  ;;  %v1209_v56 = vmul.f32 %v2221_v59, %v866_v54  ;;  %904 = vmatmul.bf16.gmra.mxu1 %v1588_v50  ;;  %984 = vmatmul.bf16.gmra.mxu3 %v1716_v51  ;;  %v1729_v50 = vld [vmem:[%s2518_s0 + $0x1f8] sm:$0xf0] }
  0xf4   :  { %v1372_v57 = vmax.f32 %v1308_v55, 0.0  ;;  %v1277_v58 = vadd.f32 %v2226_v0, %v1209_v56  ;;  %v776_v60 = vpop.f32.mrf.mxu2  ;;  %v1600_v55 = vor.u32 %v1828_v42, %v1599_v41  ;;  %v1728_v56 = vor.u32 %v1860_v46, %v1727_v45 }
  0xf5   :  { %v945_v61 = vpop.f32.mrf.mxu3 }
  0xf6   :  { %1436 = vst [vmem:[#allocation3 + $0x148] sm:$0xff] %v1372_v57  ;;  %v1341_v62 = vmax.f32 %v1277_v58, 0.0  ;;  %v946_v63 = vadd.f32 %v945_v61, %v776_v60  ;;  %v698_v1 = vpop.f32.mrf.mxu0  ;;  %v1604_v61 = vor.u32 %v1827_v47, %v1601_v48 }
  0xf7   :  { %v867_v2 = vpop.f32.mrf.mxu1 }
  0xf8   :  { %1405 = vst [vmem:[#allocation3 + $0x50] sm:$0xff] %v1341_v62  ;;  %v1241_v3 = vmul.f32 %v2221_v59, %v946_v63  ;;  %v868_v4 = vadd.f32 %v867_v2, %v698_v1  ;;  %v1732_v62 = vor.u32 %v1859_v49, %v1729_v50 }
  0xfa   :  { %v1309_v7 = vadd.f32 %v2226_v0, %v1241_v3  ;;  %v1210_v8 = vmul.f32 %v2221_v59, %v868_v4 }
  0xfc   :  { %v1373_v15 = vmax.f32 %v1309_v7, 0.0  ;;  %v1278_v16 = vadd.f32 %v2226_v0, %v1210_v8  ;;  %v778_v17 = vpop.f32.mrf.mxu2 }
  0xfd   :  { %v947_v18 = vpop.f32.mrf.mxu3 }
  0xfe   :  { %1437 = vst [vmem:[#allocation3 + $0x150] sm:$0xff] %v1373_v15  ;;  %v1342_v21 = vmax.f32 %v1278_v16, 0.0  ;;  %v948_v22 = vadd.f32 %v947_v18, %v778_v17  ;;  %v701_v23 = vpop.f32.mrf.mxu0 }
  0xff   :  { %v870_v26 = vpop.f32.mrf.mxu1 }
 0x100   :  { %1406 = vst [vmem:[#allocation3 + $0x58] sm:$0xff] %v1342_v21  ;;  %v1242_v27 = vmul.f32 %v2221_v59, %v948_v22  ;;  %v871_v28 = vadd.f32 %v870_v26, %v701_v23 }
 0x101   :  { %740 = vmatmul.bf16.gmra.mxu0 %v1592_v19  ;;  %820 = vmatmul.bf16.gmra.mxu2 %v1720_v20 }
 0x102   :  { %v1310_v29 = vadd.f32 %v2226_v0, %v1242_v27  ;;  %v1211_v30 = vmul.f32 %v2221_v59, %v871_v28  ;;  %909 = vmatmul.bf16.gmra.mxu1 %v1596_v24  ;;  %989 = vmatmul.bf16.gmra.mxu3 %v1724_v25 }
 0x104   :  { %v1374_v31 = vmax.f32 %v1310_v29, 0.0  ;;  %v1279_v32 = vadd.f32 %v2226_v0, %v1211_v30  ;;  %v781_v33 = vpop.f32.mrf.mxu2 }
 0x105   :  { %v950_v34 = vpop.f32.mrf.mxu3 }
 0x106   :  { %1438 = vst [vmem:[#allocation3 + $0x158] sm:$0xff] %v1374_v31  ;;  %v1343_v35 = vmax.f32 %v1279_v32, 0.0  ;;  %v951_v36 = vadd.f32 %v950_v34, %v781_v33  ;;  %v703_v37 = vpop.f32.mrf.mxu0 }
 0x107   :  { %v872_v38 = vpop.f32.mrf.mxu1 }
 0x108   :  { %1407 = vst [vmem:[#allocation3 + $0x60] sm:$0xff] %v1343_v35  ;;  %v1243_v39 = vmul.f32 %v2221_v59, %v951_v36  ;;  %v873_v40 = vadd.f32 %v872_v38, %v703_v37 }
 0x10a   :  { %v1311_v43 = vadd.f32 %v2226_v0, %v1243_v39  ;;  %v1212_v44 = vmul.f32 %v2221_v59, %v873_v40 }
 0x10c   :  { %v1375_v51 = vmax.f32 %v1311_v43, 0.0  ;;  %v1280_v52 = vadd.f32 %v2226_v0, %v1212_v44  ;;  %v783_v53 = vpop.f32.mrf.mxu2 }
 0x10d   :  { %v952_v54 = vpop.f32.mrf.mxu3 }
 0x10e   :  { %1439 = vst [vmem:[#allocation3 + $0x160] sm:$0xff] %v1375_v51  ;;  %v1344_v57 = vmax.f32 %v1280_v52, 0.0  ;;  %v953_v58 = vadd.f32 %v952_v54, %v783_v53  ;;  %v706_v60 = vpop.f32.mrf.mxu0 }
 0x10f   :  { %v875_v63 = vpop.f32.mrf.mxu1 }
 0x110   :  { %1408 = vst [vmem:[#allocation3 + $0x68] sm:$0xff] %v1344_v57  ;;  %v1244_v1 = vmul.f32 %v2221_v59, %v953_v58  ;;  %v876_v2 = vadd.f32 %v875_v63, %v706_v60 }
 0x111   :  { %745 = vmatmul.bf16.gmra.mxu0 %v1600_v55  ;;  %825 = vmatmul.bf16.gmra.mxu2 %v1728_v56 }
 0x112   :  { %v1312_v3 = vadd.f32 %v2226_v0, %v1244_v1  ;;  %v1213_v4 = vmul.f32 %v2221_v59, %v876_v2  ;;  %914 = vmatmul.bf16.gmra.mxu1 %v1604_v61  ;;  %994 = vmatmul.bf16.gmra.mxu3 %v1732_v62 }
 0x114   :  { %v1376_v5 = vmax.f32 %v1312_v3, 0.0  ;;  %v1281_v6 = vadd.f32 %v2226_v0, %v1213_v4  ;;  %v786_v7 = vpop.f32.mrf.mxu2 }
 0x115   :  { %v955_v8 = vpop.f32.mrf.mxu3 }
 0x116   :  { %1440 = vst [vmem:[#allocation3 + $0x168] sm:$0xff] %v1376_v5  ;;  %v1345_v9 = vmax.f32 %v1281_v6, 0.0  ;;  %v956_v10 = vadd.f32 %v955_v8, %v786_v7  ;;  %v708_v11 = vpop.f32.mrf.mxu0 }
 0x117   :  { %v877_v12 = vpop.f32.mrf.mxu1 }
 0x118   :  { %1409 = vst [vmem:[#allocation3 + $0x70] sm:$0xff] %v1345_v9  ;;  %v1245_v13 = vmul.f32 %v2221_v59, %v956_v10  ;;  %v878_v14 = vadd.f32 %v877_v12, %v708_v11 }
 0x11a   :  { %v1313_v15 = vadd.f32 %v2226_v0, %v1245_v13  ;;  %v1214_v16 = vmul.f32 %v2221_v59, %v878_v14 }
 0x11c   :  { %v1377_v17 = vmax.f32 %v1313_v15, 0.0  ;;  %v1282_v18 = vadd.f32 %v2226_v0, %v1214_v16  ;;  %v788_v19 = vpop.f32.mrf.mxu2 }
 0x11d   :  { %v957_v20 = vpop.f32.mrf.mxu3 }
 0x11e   :  { %1441 = vst [vmem:[#allocation3 + $0x170] sm:$0xff] %v1377_v17  ;;  %v1346_v21 = vmax.f32 %v1282_v18, 0.0  ;;  %v958_v22 = vadd.f32 %v957_v20, %v788_v19  ;;  %v711_v23 = vpop.f32.mrf.mxu0 }
 0x11f   :  { %v880_v24 = vpop.f32.mrf.mxu1 }
 0x120   :  { %1410 = vst [vmem:[#allocation3 + $0x78] sm:$0xff] %v1346_v21  ;;  %v1246_v25 = vmul.f32 %v2221_v59, %v958_v22  ;;  %v881_v26 = vadd.f32 %v880_v24, %v711_v23 }
 0x122   :  { %v1314_v27 = vadd.f32 %v2226_v0, %v1246_v25  ;;  %v1215_v28 = vmul.f32 %v2221_v59, %v881_v26 }
 0x124   :  { %v1378_v29 = vmax.f32 %v1314_v27, 0.0  ;;  %v1283_v30 = vadd.f32 %v2226_v0, %v1215_v28  ;;  %v791_v31 = vpop.f32.mrf.mxu2 }
 0x125   :  { %v960_v32 = vpop.f32.mrf.mxu3 }
 0x126   :  { %1442 = vst [vmem:[#allocation3 + $0x178] sm:$0xff] %v1378_v29  ;;  %v1347_v33 = vmax.f32 %v1283_v30, 0.0  ;;  %v961_v34 = vadd.f32 %v960_v32, %v791_v31  ;;  %v713_v35 = vpop.f32.mrf.mxu0 }
 0x127   :  { %v882_v36 = vpop.f32.mrf.mxu1 }
 0x128   :  { %1411 = vst [vmem:[#allocation3 + $0x80] sm:$0xff] %v1347_v33  ;;  %v1247_v37 = vmul.f32 %v2221_v59, %v961_v34  ;;  %v883_v38 = vadd.f32 %v882_v36, %v713_v35 }
 0x12a   :  { %v1315_v39 = vadd.f32 %v2226_v0, %v1247_v37  ;;  %v1216_v40 = vmul.f32 %v2221_v59, %v883_v38 }
 0x12c   :  { %v1379_v41 = vmax.f32 %v1315_v39, 0.0  ;;  %v1284_v42 = vadd.f32 %v2226_v0, %v1216_v40  ;;  %v793_v43 = vpop.f32.mrf.mxu2 }
 0x12d   :  { %v962_v44 = vpop.f32.mrf.mxu3 }
 0x12e   :  { %1443 = vst [vmem:[#allocation3 + $0x180] sm:$0xff] %v1379_v41  ;;  %v1348_v45 = vmax.f32 %v1284_v42, 0.0  ;;  %v963_v46 = vadd.f32 %v962_v44, %v793_v43  ;;  %v716_v47 = vpop.f32.mrf.mxu0 }
 0x12f   :  { %v885_v48 = vpop.f32.mrf.mxu1 }
 0x130   :  { %1412 = vst [vmem:[#allocation3 + $0x88] sm:$0xff] %v1348_v45  ;;  %v1248_v49 = vmul.f32 %v2221_v59, %v963_v46  ;;  %v886_v50 = vadd.f32 %v885_v48, %v716_v47 }
 0x132   :  { %v1316_v51 = vadd.f32 %v2226_v0, %v1248_v49  ;;  %v1217_v52 = vmul.f32 %v2221_v59, %v886_v50 }
 0x134   :  { %v1380_v53 = vmax.f32 %v1316_v51, 0.0  ;;  %v1285_v54 = vadd.f32 %v2226_v0, %v1217_v52  ;;  %v796_v55 = vpop.f32.mrf.mxu2 }
 0x135   :  { %v965_v56 = vpop.f32.mrf.mxu3 }
 0x136   :  { %1444 = vst [vmem:[#allocation3 + $0x188] sm:$0xff] %v1380_v53  ;;  %v1349_v57 = vmax.f32 %v1285_v54, 0.0  ;;  %v966_v58 = vadd.f32 %v965_v56, %v796_v55  ;;  %v718_v60 = vpop.f32.mrf.mxu0 }
 0x137   :  { %v887_v61 = vpop.f32.mrf.mxu1 }
 0x138   :  { %1413 = vst [vmem:[#allocation3 + $0x90] sm:$0xff] %v1349_v57  ;;  %v1249_v62 = vmul.f32 %v2221_v59, %v966_v58  ;;  %v888_v63 = vadd.f32 %v887_v61, %v718_v60 }
 0x13a   :  { %v1317_v1 = vadd.f32 %v2226_v0, %v1249_v62  ;;  %v1218_v2 = vmul.f32 %v2221_v59, %v888_v63 }
 0x13c   :  { %v1381_v3 = vmax.f32 %v1317_v1, 0.0  ;;  %v1286_v4 = vadd.f32 %v2226_v0, %v1218_v2  ;;  %v798_v5 = vpop.f32.mrf.mxu2 }
 0x13d   :  { %v967_v6 = vpop.f32.mrf.mxu3 }
 0x13e   :  { %1445 = vst [vmem:[#allocation3 + $0x190] sm:$0xff] %v1381_v3  ;;  %v1350_v7 = vmax.f32 %v1286_v4, 0.0  ;;  %v968_v8 = vadd.f32 %v967_v6, %v798_v5  ;;  %v721_v9 = vpop.f32.mrf.mxu0 }
 0x13f   :  { %v890_v10 = vpop.f32.mrf.mxu1 }
 0x140   :  { %1414 = vst [vmem:[#allocation3 + $0x98] sm:$0xff] %v1350_v7  ;;  %v1250_v11 = vmul.f32 %v2221_v59, %v968_v8  ;;  %v891_v12 = vadd.f32 %v890_v10, %v721_v9 }
 0x142   :  { %v1318_v13 = vadd.f32 %v2226_v0, %v1250_v11  ;;  %v1219_v14 = vmul.f32 %v2221_v59, %v891_v12 }
 0x144   :  { %v1382_v15 = vmax.f32 %v1318_v13, 0.0  ;;  %v1287_v16 = vadd.f32 %v2226_v0, %v1219_v14  ;;  %v801_v17 = vpop.f32.mrf.mxu2 }
 0x145   :  { %v970_v18 = vpop.f32.mrf.mxu3 }
 0x146   :  { %1446 = vst [vmem:[#allocation3 + $0x198] sm:$0xff] %v1382_v15  ;;  %v1351_v19 = vmax.f32 %v1287_v16, 0.0  ;;  %v971_v20 = vadd.f32 %v970_v18, %v801_v17  ;;  %v723_v21 = vpop.f32.mrf.mxu0 }
 0x147   :  { %v892_v22 = vpop.f32.mrf.mxu1 }
 0x148   :  { %1415 = vst [vmem:[#allocation3 + $0xa0] sm:$0xff] %v1351_v19  ;;  %v1251_v23 = vmul.f32 %v2221_v59, %v971_v20  ;;  %v893_v24 = vadd.f32 %v892_v22, %v723_v21 }
 0x14a   :  { %v1319_v25 = vadd.f32 %v2226_v0, %v1251_v23  ;;  %v1220_v26 = vmul.f32 %v2221_v59, %v893_v24 }
 0x14c   :  { %v1383_v27 = vmax.f32 %v1319_v25, 0.0  ;;  %v1288_v28 = vadd.f32 %v2226_v0, %v1220_v26  ;;  %v803_v29 = vpop.f32.mrf.mxu2 }
 0x14d   :  { %v972_v30 = vpop.f32.mrf.mxu3 }
 0x14e   :  { %1447 = vst [vmem:[#allocation3 + $0x1a0] sm:$0xff] %v1383_v27  ;;  %v1352_v31 = vmax.f32 %v1288_v28, 0.0  ;;  %v973_v32 = vadd.f32 %v972_v30, %v803_v29  ;;  %v726_v33 = vpop.f32.mrf.mxu0 }
 0x14f   :  { %v895_v34 = vpop.f32.mrf.mxu1 }
 0x150   :  { %1416 = vst [vmem:[#allocation3 + $0xa8] sm:$0xff] %v1352_v31  ;;  %v1252_v35 = vmul.f32 %v2221_v59, %v973_v32  ;;  %v896_v36 = vadd.f32 %v895_v34, %v726_v33 }
 0x152   :  { %v1320_v37 = vadd.f32 %v2226_v0, %v1252_v35  ;;  %v1221_v38 = vmul.f32 %v2221_v59, %v896_v36 }
 0x154   :  { %v1384_v39 = vmax.f32 %v1320_v37, 0.0  ;;  %v1289_v40 = vadd.f32 %v2226_v0, %v1221_v38  ;;  %v806_v41 = vpop.f32.mrf.mxu2 }
 0x155   :  { %v975_v42 = vpop.f32.mrf.mxu3 }
 0x156   :  { %1448 = vst [vmem:[#allocation3 + $0x1a8] sm:$0xff] %v1384_v39  ;;  %v1353_v43 = vmax.f32 %v1289_v40, 0.0  ;;  %v976_v44 = vadd.f32 %v975_v42, %v806_v41  ;;  %v728_v45 = vpop.f32.mrf.mxu0 }
 0x157   :  { %v897_v46 = vpop.f32.mrf.mxu1 }
 0x158   :  { %1417 = vst [vmem:[#allocation3 + $0xb0] sm:$0xff] %v1353_v43  ;;  %v1253_v47 = vmul.f32 %v2221_v59, %v976_v44  ;;  %v898_v48 = vadd.f32 %v897_v46, %v728_v45 }
 0x15a   :  { %v1321_v49 = vadd.f32 %v2226_v0, %v1253_v47  ;;  %v1222_v50 = vmul.f32 %v2221_v59, %v898_v48  ;;  %v1898_v48 = vld [vmem:[%s2520_s2] ss:$0 sm:$0xff]  ;;  %s1926_s2 = smov [#allocation3]  }
 0x15c   :  { %v1385_v51 = vmax.f32 %v1321_v49, 0.0  ;;  %v1290_v52 = vadd.f32 %v2226_v0, %v1222_v50  ;;  %v808_v53 = vpop.f32.mrf.mxu2 }
 0x15d   :  { %v977_v54 = vpop.f32.mrf.mxu3 }
 0x15e   :  { %1449 = vst [vmem:[#allocation3 + $0x1b0] sm:$0xff] %v1385_v51  ;;  %v1354_v55 = vmax.f32 %v1290_v52, 0.0  ;;  %v978_v56 = vadd.f32 %v977_v54, %v808_v53  ;;  %v731_v57 = vpop.f32.mrf.mxu0 }
 0x15f   :  { %v900_v58 = vpop.f32.mrf.mxu1 }
 0x160   :  { %1418 = vst [vmem:[#allocation3 + $0xb8] sm:$0xff] %v1354_v55  ;;  %v1254_v60 = vmul.f32 %v2221_v59, %v978_v56  ;;  %v901_v61 = vadd.f32 %v900_v58, %v731_v57 }
 0x162   :  { %v1322_v62 = vadd.f32 %v2226_v0, %v1254_v60  ;;  %v1223_v63 = vmul.f32 %v2221_v59, %v901_v61  ;;  %v1899_v60 = vld [vmem:[%s2521_s3] ss:$0 sm:$0xff]  ;;  %s1463_s3 = sshll.u32 %s1926_s2, 4  ;;  %s1464_s3 = int_to_ptr.vmem [resolvable:$true] %s1463_s3 }
 0x164   :  { %v1386_v1 = vmax.f32 %v1322_v62, 0.0  ;;  %v1291_v2 = vadd.f32 %v2226_v0, %v1223_v63  ;;  %v811_v3 = vpop.f32.mrf.mxu2 }
 0x165   :  { %v980_v4 = vpop.f32.mrf.mxu3 }
 0x166   :  { %1450 = vst [vmem:[#allocation3 + $0x1b8] sm:$0xff] %v1386_v1  ;;  %v1355_v5 = vmax.f32 %v1291_v2, 0.0  ;;  %v981_v6 = vadd.f32 %v980_v4, %v811_v3  ;;  %v733_v7 = vpop.f32.mrf.mxu0 }
 0x167   :  { %v902_v8 = vpop.f32.mrf.mxu1 }
 0x168   :  { %1419 = vst [vmem:[#allocation3 + $0xc0] sm:$0xff] %v1355_v5  ;;  %v1255_v9 = vmul.f32 %v2221_v59, %v981_v6  ;;  %v903_v10 = vadd.f32 %v902_v8, %v733_v7 }
 0x16a   :  { %v1323_v11 = vadd.f32 %v2226_v0, %v1255_v9  ;;  %v1224_v12 = vmul.f32 %v2221_v59, %v903_v10 }
 0x16c   :  { %v1387_v13 = vmax.f32 %v1323_v11, 0.0  ;;  %v1292_v14 = vadd.f32 %v2226_v0, %v1224_v12  ;;  %v813_v15 = vpop.f32.mrf.mxu2 }
 0x16d   :  { %v982_v16 = vpop.f32.mrf.mxu3 }
 0x16e   :  { %1451 = vst [vmem:[#allocation3 + $0x1c0] sm:$0xff] %v1387_v13  ;;  %v1356_v17 = vmax.f32 %v1292_v14, 0.0  ;;  %v983_v18 = vadd.f32 %v982_v16, %v813_v15  ;;  %v736_v19 = vpop.f32.mrf.mxu0 }
 0x16f   :  { %v905_v20 = vpop.f32.mrf.mxu1 }
 0x170   :  { %1420 = vst [vmem:[#allocation3 + $0xc8] sm:$0xff] %v1356_v17  ;;  %v1256_v21 = vmul.f32 %v2221_v59, %v983_v18  ;;  %v906_v22 = vadd.f32 %v905_v20, %v736_v19 }
 0x172   :  { %v1324_v23 = vadd.f32 %v2226_v0, %v1256_v21  ;;  %v1225_v24 = vmul.f32 %v2221_v59, %v906_v22 }
 0x174   :  { %v1388_v25 = vmax.f32 %v1324_v23, 0.0  ;;  %v1293_v26 = vadd.f32 %v2226_v0, %v1225_v24  ;;  %v816_v27 = vpop.f32.mrf.mxu2 }
 0x175   :  { %v985_v28 = vpop.f32.mrf.mxu3 }
 0x176   :  { %1452 = vst [vmem:[#allocation3 + $0x1c8] sm:$0xff] %v1388_v25  ;;  %v1357_v29 = vmax.f32 %v1293_v26, 0.0  ;;  %v986_v30 = vadd.f32 %v985_v28, %v816_v27  ;;  %v738_v31 = vpop.f32.mrf.mxu0 }
 0x177   :  { %v907_v32 = vpop.f32.mrf.mxu1 }
 0x178   :  { %1421 = vst [vmem:[#allocation3 + $0xd0] sm:$0xff] %v1357_v29  ;;  %v1257_v33 = vmul.f32 %v2221_v59, %v986_v30  ;;  %v908_v34 = vadd.f32 %v907_v32, %v738_v31 }
 0x17a   :  { %v1325_v35 = vadd.f32 %v2226_v0, %v1257_v33  ;;  %v1226_v36 = vmul.f32 %v2221_v59, %v908_v34 }
 0x17c   :  { %v1389_v37 = vmax.f32 %v1325_v35, 0.0  ;;  %v1294_v38 = vadd.f32 %v2226_v0, %v1226_v36  ;;  %v818_v39 = vpop.f32.mrf.mxu2 }
 0x17d   :  { %v987_v40 = vpop.f32.mrf.mxu3 }
 0x17e   :  { %1453 = vst [vmem:[#allocation3 + $0x1d0] sm:$0xff] %v1389_v37  ;;  %v1358_v41 = vmax.f32 %v1294_v38, 0.0  ;;  %v988_v42 = vadd.f32 %v987_v40, %v818_v39  ;;  %v741_v43 = vpop.f32.mrf.mxu0 }
 0x17f   :  { %v910_v44 = vpop.f32.mrf.mxu1 }
 0x180   :  { %1422 = vst [vmem:[#allocation3 + $0xd8] sm:$0xff] %v1358_v41  ;;  %v1258_v45 = vmul.f32 %v2221_v59, %v988_v42  ;;  %v911_v46 = vadd.f32 %v910_v44, %v741_v43 }
 0x182   :  { %v1326_v47 = vadd.f32 %v2226_v0, %v1258_v45  ;;  %v1227_v49 = vmul.f32 %v1898_v48, %v911_v46 }
 0x184   :  { %v1390_v50 = vmax.f32 %v1326_v47, 0.0  ;;  %v1295_v51 = vadd.f32 %v2226_v0, %v1227_v49  ;;  %v821_v52 = vpop.f32.mrf.mxu2 }
 0x185   :  { %v990_v53 = vpop.f32.mrf.mxu3 }
 0x186   :  { %1454 = vst [vmem:[#allocation3 + $0x1d8] sm:$0xff] %v1390_v50  ;;  %v1359_v54 = vmax.f32 %v1295_v51, 0.0  ;;  %v991_v55 = vadd.f32 %v990_v53, %v821_v52  ;;  %v743_v56 = vpop.f32.mrf.mxu0 }
 0x187   :  { %v912_v57 = vpop.f32.mrf.mxu1 }
 0x188   :  { %1423 = vst [vmem:[#allocation3 + $0xe0] sm:$0xff] %v1359_v54  ;;  %v1259_v59 = vmul.f32 %v1898_v48, %v991_v55  ;;  %v913_v58 = vadd.f32 %v912_v57, %v743_v56 }
 0x18a   :  { %v1327_v61 = vadd.f32 %v1899_v60, %v1259_v59  ;;  %v1228_v62 = vmul.f32 %v1898_v48, %v913_v58 }
 0x18c   :  { %v1391_v63 = vmax.f32 %v1327_v61, 0.0  ;;  %v1296_v1 = vadd.f32 %v1899_v60, %v1228_v62  ;;  %v823_v2 = vpop.f32.mrf.mxu2 }
 0x18d   :  { %v992_v0 = vpop.f32.mrf.mxu3 }
 0x18e   :  { %1455 = vst [vmem:[#allocation3 + $0x1e0] sm:$0xff] %v1391_v63  ;;  %v1360_v3 = vmax.f32 %v1296_v1, 0.0  ;;  %v993_v4 = vadd.f32 %v992_v0, %v823_v2  ;;  %v746_v5 = vpop.f32.mrf.mxu0 }
 0x18f   :  { %v915_v6 = vpop.f32.mrf.mxu1 }
 0x190   :  { %1424 = vst [vmem:[#allocation3 + $0xe8] sm:$0xff] %v1360_v3  ;;  %v1260_v7 = vmul.f32 %v1898_v48, %v993_v4  ;;  %v916_v8 = vadd.f32 %v915_v6, %v746_v5 }
 0x192   :  { %v1328_v9 = vadd.f32 %v1899_v60, %v1260_v7  ;;  %v1229_v10 = vmul.f32 %v1898_v48, %v916_v8 }
 0x194   :  { %v1392_v11 = vmax.f32 %v1328_v9, 0.0  ;;  %v1297_v12 = vadd.f32 %v1899_v60, %v1229_v10  ;;  %v826_v13 = vpop.f32.mrf.mxu2 }
 0x195   :  { %v995_v14 = vpop.f32.mrf.mxu3 }
 0x196   :  { %1456 = vst [vmem:[#allocation3 + $0x1e8] sm:$0xff] %v1392_v11  ;;  %v1361_v15 = vmax.f32 %v1297_v12, 0.0  ;;  %v996_v16 = vadd.f32 %v995_v14, %v826_v13  ;;  %v748_v17 = vpop.f32.mrf.mxu0 }
 0x197   :  { %v917_v18 = vpop.f32.mrf.mxu1 }
 0x198   :  { %1425 = vst [vmem:[#allocation3 + $0xf0] sm:$0xff] %v1361_v15  ;;  %v1261_v19 = vmul.f32 %v1898_v48, %v996_v16  ;;  %v918_v20 = vadd.f32 %v917_v18, %v748_v17 }
 0x19a   :  { %v1329_v21 = vadd.f32 %v1899_v60, %v1261_v19  ;;  %v1230_v22 = vmul.f32 %v1898_v48, %v918_v20 }
 0x19c   :  { %v1393_v23 = vmax.f32 %v1329_v21, 0.0  ;;  %v1298_v24 = vadd.f32 %v1899_v60, %v1230_v22  ;;  %v828_v25 = vpop.f32.mrf.mxu2 }
 0x19d   :  { %v997_v26 = vpop.f32.mrf.mxu3 }
 0x19e   :  { %1457 = vst [vmem:[#allocation3 + $0x1f0] sm:$0xff] %v1393_v23  ;;  %v1362_v27 = vmax.f32 %v1298_v24, 0.0  ;;  %v998_v28 = vadd.f32 %v997_v26, %v828_v25 }
 0x1a0   :  { %1426 = vst [vmem:[#allocation3 + $0xf8] sm:$0xff] %v1362_v27  ;;  %v1262_v29 = vmul.f32 %v1898_v48, %v998_v28 }
 0x1a2   :  { %v1330_v30 = vadd.f32 %v1899_v60, %v1262_v29 }
 0x1a4   :  { %v1394_v31 = vmax.f32 %v1330_v30, 0.0 }
 0x1a6   :  { %1458 = vst [vmem:[#allocation3 + $0x1f8] sm:$0xff] %v1394_v31 }
 0x1a7   :  { %1471 = dma.vmem_to_hbm [thread:$0]  %s1464_s3, 8192, %s1466_s16, [#allocation4], %s1927_s17, %s1927_s17, %s1928_s18  }
 0x1a8   :  { %1924 = dma.done.wait [#allocation4], 8192  }
 0x1a9   :  { %1925 = vsyncadd [#allocation4], 4294959104 }
 0x1aa   :  { %1476 = vsyncpa [#allocation4], 1 }

</bundles_post_ra>
